<compile_context>
chip_gen: v7x
topology: tpu7x:2x2x1
jax: 0.10.0
libtpu: 0.0.40
codegen_flags: <defaults>
</compile_context>

<pallas_src>
import functools

import jax
import jax.numpy as jnp
from jax.experimental import pallas as pl
from jax.experimental.pallas import tpu as pltpu

_LANE_W = 1024                          # wide, lane-dense last dim (multiple of 128)
_TARGET_BLOCK_BYTES = 2 * 1024 * 1024   # ~2 MiB per block per buffer


def _scale_kernel(g_ref, o_ref, *, scale):
    # Elementwise scale of the upstream-gradient tile by a static Python scalar
    # (lambda_ / on are static nondiff args, so the scale is baked in at trace
    # time -- no SMEM operand, no dtype promotion surprises).
    o_ref[...] = g_ref[...] * scale


def _scale_pallas(g, scale):
    """out = scale * g as a single memory-bound Pallas pass."""
    orig_shape, orig_dtype = g.shape, g.dtype
    flat = g.reshape(-1)
    n = flat.shape[0]

    itemsize = jnp.dtype(orig_dtype).itemsize
    # dtype-robust sublane multiple: 8 for f32, 16 for bf16, 32 for int8/fp8.
    sub = max(8, 32 // itemsize)
    block_rows = max(sub, (_TARGET_BLOCK_BYTES // (_LANE_W * itemsize)) // sub * sub)
    chunk = block_rows * _LANE_W

    if n <= chunk:
        # Single full-extent block: the (8,128) divisibility rule is waived when
        # block_shape equals the full array dims; only pad the lane dim if needed.
        pad = (-n) % _LANE_W
    else:
        # Tiled path: pad (gated, bounded by < 2 MiB) so the grid divides evenly.
        pad = (-n) % chunk
    if pad:
        flat = jnp.pad(flat, (0, pad))

    slab = flat.reshape(-1, _LANE_W)
    rows = slab.shape[0]
    rows_per_block = rows if n <= chunk else block_rows
    grid = (rows // rows_per_block,)

    out_slab = pl.pallas_call(
        functools.partial(_scale_kernel, scale=scale),
        out_shape=jax.ShapeDtypeStruct(slab.shape, slab.dtype),
        grid_spec=pltpu.PrefetchScalarGridSpec(
            num_scalar_prefetch=0,
            grid=grid,
            in_specs=[pl.BlockSpec((rows_per_block, _LANE_W), lambda i: (i, 0))],
            out_specs=pl.BlockSpec((rows_per_block, _LANE_W), lambda i: (i, 0)),
        ),
        compiler_params=pltpu.CompilerParams(
            dimension_semantics=("parallel",)   # lets v7x shard blocks over 2 TCs
        ),
        # Scale in place on the (donatable) gradient slab: no extra output alloc.
        input_output_aliases={0: 0},
    )(slab)

    out = out_slab.reshape(-1)
    if pad:
        out = out[:n]
    return out.reshape(orig_shape).astype(orig_dtype)


@functools.partial(jax.custom_vjp, nondiff_argnums=(1, 2))
def gradient_reversal(x, lambda_=1.0, on=True):
    """Forward = identity (zero-copy); backward = (-lambda if on else +lambda) * grad."""
    return x


def _grl_fwd(x, lambda_, on):
    # Identity forward; JAX arrays are immutable so PyTorch's .clone() is moot.
    return x, None


def _grl_bwd(lambda_, on, _res, g):
    scale = -float(lambda_) if on else float(lambda_)
    return (_scale_pallas(g, scale),)


gradient_reversal.defvjp(_grl_fwd, _grl_bwd)


class GradientReversal:
    """JAX/Pallas equivalent of the PyTorch GradientReversal module."""

    def __init__(self, lambda_=1, on=True):
        self.lambda_ = lambda_
        self.on = on

    def __call__(self, x):
        return gradient_reversal(x, self.lambda_, self.on)


if __name__ == "__main__":
    key = jax.random.PRNGKey(0)
    # NCHW input, small shapes: batch=2, channels=4, spatial=16x16
    x = jax.random.normal(key, (2, 4, 16, 16), dtype=jnp.float32)

    module = GradientReversal(lambda_=1, on=True)

    # Forward pass (identity, zero-copy)
    y = jax.block_until_ready(module(x))
    assert y.shape == x.shape and y.dtype == x.dtype
    assert bool(jnp.allclose(y, x)), "forward must be identity"

    # Backward pass (Pallas scale kernel): d/dx sum(GRL(x)) == -lambda
    grad = jax.block_until_ready(
        jax.grad(lambda a: jnp.sum(gradient_reversal(a, 1.0, True)))(x)
    )
    assert bool(jnp.allclose(grad, -jnp.ones_like(x))), "backward must reverse gradient"

    # on=False path: gradient passes through scaled by +lambda
    grad_off = jax.block_until_ready(
        jax.grad(lambda a: jnp.sum(gradient_reversal(a, 0.5, False)))(x)
    )
    assert bool(jnp.allclose(grad_off, 0.5 * jnp.ones_like(x)))

    print("KERNEL_OK")
</pallas_src>

<mosaic_0001>
module attributes {stable_mosaic.version = 11 : i64} {
  func.func @_scale_kernel(%arg0: i32, %arg1: memref<2x1024xf32, #tpu.memory_space<vmem>>, %arg2: memref<2x1024xf32, #tpu.memory_space<vmem>>) attributes {dimension_semantics = [#tpu.dimension_semantics<parallel>], iteration_bounds = array<i64: 1>, scalar_prefetch = 0 : i64, scratch_operands = 0 : i64, tpu.core_type = #tpu.core_type<tc>, window_params = [{transform_indices = @transform_0, window_bounds = array<i64: 2, 1024>}, {transform_indices = @transform_1, window_bounds = array<i64: 2, 1024>}]} {
    %c0 = arith.constant 0 : index
    %c0_0 = arith.constant 0 : index
    %0 = vector.load %arg1[%c0, %c0_0] : memref<2x1024xf32, #tpu.memory_space<vmem>>, vector<2x1024xf32>
    %cst = arith.constant -1.000000e+00 : f32
    %1 = vector.broadcast %cst : f32 to vector<2x1024xf32>
    %2 = arith.mulf %0, %1 : vector<2x1024xf32>
    %c0_1 = arith.constant 0 : index
    %c0_2 = arith.constant 0 : index
    %3 = vector.load %arg2[%c0_1, %c0_2] : memref<2x1024xf32, #tpu.memory_space<vmem>>, vector<2x1024xf32>
    tpu.vector_store %arg2[%c0_1, %c0_2], %2 {strides = array<i32>} : memref<2x1024xf32, #tpu.memory_space<vmem>>, vector<2x1024xf32>,
    return
  }
  func.func @transform_0(%arg0: i32) -> (i32, i32) {
    %c0_i32 = arith.constant 0 : i32
    %c0_i32_0 = arith.constant 0 : i32
    return %arg0, %c0_i32 : i32, i32
  }
  func.func @transform_1(%arg0: i32) -> (i32, i32) {
    %c0_i32 = arith.constant 0 : i32
    %c0_i32_0 = arith.constant 0 : i32
    return %arg0, %c0_i32 : i32, i32
  }
}

</mosaic_0001>

<bundles_post_ra>
// kernel: tpu_custom_call.1
= control target key start
LH: loop header
LB: loop body
LE: loop exit
PB: predicated region body
PF: predicated region fallthrough
CT: control target
= control target key end

     0   :  { %6 = vsyncpa [#allocation3], 0  ;;  %s128_s0 = inlined_call_operand.hbm [shape: f32[2,1024], index: 0, kind: input, shape index: {}, may-alias: {0,1}]   ;;  %s129_s1 = inlined_call_operand.hbm [shape: f32[2,1024], index: 1, kind: output, shape index: {}, may-alias: {0,1}]  }
   0x1   :  { %7 = vsyncpa [#allocation4], 0  ;;  %s92_s6 = smov [#allocation2]   ;;  %s44_s10 = scalar_lea.hbm %s128_s0, 256 }
   0x2   :  { %s14_s7 = sshll.u32 %s92_s6, 4  ;;  %p45_p0 = scmp.ne.s32.totalorder %s128_s0, %s44_s10  ;;  %s15_s7 = int_to_ptr.vmem [resolvable:$true] %s14_s7 }
   0x3   :  { %p48_p1 = scmp.lt.u32.totalorder %s44_s10, %s128_s0 }
   0x5   :  { %p50_p2 = pnand %p48_p1, %p45_p0 }
   0x7   :  { %53 = shalt.err (!%p50_p2)
}
   0x8   :  { %s54_s15 = scalar_lea.vmem %s15_s7, 256  ;;  %p59_p4 = scmp.lt.s32.totalorder %s15_s7, %s15_s7 }
   0x9   :  { %p55_p3 = scmp.ne.s32.totalorder %s15_s7, %s54_s15  ;;  %p60_p5 = scmp.lt.s32.totalorder %s54_s15, %s54_s15 }
   0xb   :  { %p61_p6 = por %p60_p5, %p59_p4 }
   0xd   :  { %p62_p7 = pnand %p61_p6, %p55_p3 }
   0xf   :  { %65 = shalt.err (!%p62_p7)
}
  0x10   :  { %17 = dma.hbm_to_vmem [thread:$0]  %s128_s0, 256, %s15_s7, [#allocation3]  }
  0x11   :  { %88 = dma.done.wait [#allocation3], 256  }
  0x12   :  { %89 = vsyncadd [#allocation3], 4294967040  ;;  %s93_s18 = smov [#allocation5]   ;;  %v21_v0 = vld [vmem:[#allocation2] sm:$0xff]  ;;  %v22_v1 = vld [vmem:[#allocation2 + $0x8] sm:$0xff] }
  0x13   :  { %s33_s19 = sshll.u32 %s93_s18, 4  ;;  %v23_v2 = vmul.f32 -1.0, %v21_v0  ;;  %v24_v3 = vmul.f32 -1.0, %v22_v1  ;;  %s34_s19 = int_to_ptr.vmem [resolvable:$true] %s33_s19 }
  0x14   :  { %s66_s20 = scalar_lea.vmem %s34_s19, 256  ;;  %p71_p9 = scmp.lt.s32.totalorder %s34_s19, %s34_s19 }
  0x15   :  { %25 = vst [vmem:[#allocation5] sm:$0xff] %v23_v2  ;;  %26 = vst [vmem:[#allocation5 + $0x8] sm:$0xff] %v24_v3  ;;  %p67_p8 = scmp.ne.s32.totalorder %s34_s19, %s66_s20  ;;  %p72_p10 = scmp.lt.s32.totalorder %s66_s20, %s66_s20 }
  0x17   :  { %p73_p11 = por %p72_p10, %p71_p9 }
  0x19   :  { %p74_p12 = pnand %p73_p11, %p67_p8 }
  0x1b   :  { %77 = shalt.err (!%p74_p12)
}
  0x1c   :  { %s78_s22 = scalar_lea.hbm %s129_s1, 256 }
  0x1d   :  { %p79_p13 = scmp.ne.s32.totalorder %s129_s1, %s78_s22  ;;  %p82_p0 = scmp.lt.u32.totalorder %s78_s22, %s129_s1 }
  0x1f   :  { %p84_p1 = pnand %p82_p0, %p79_p13 }
  0x21   :  { %87 = shalt.err (!%p84_p1)
}
  0x22   :  { %36 = dma.vmem_to_hbm [thread:$0]  %s34_s19, 256, %s129_s1, [#allocation4]  }
  0x23   :  { %90 = dma.done.wait [#allocation4], 256  }
  0x24   :  { %91 = vsyncadd [#allocation4], 4294967040 }
  0x25   :  { %40 = vsyncpa [#allocation3], 1 }
  0x26   :  { %41 = vsyncpa [#allocation4], 1 }

</bundles_post_ra>
